<compile_context>
chip_gen: v7x
topology: tpu7x:2x2x1
jax: 0.10.0
libtpu: 0.0.40
codegen_flags: <defaults>
</compile_context>

<pallas_src>
import jax
import jax.numpy as jnp
from jax.experimental import pallas as pl
from jax.experimental.pallas import tpu as pltpu

LN_EPS = 1e-5


def _round_up(x, m):
    return ((x + m - 1) // m) * m


def _ln_cols(x, n):
    """LayerNorm normalization over the feature (sublane) axis 0, one pass.

    gamma/beta are folded into the following Linear, so this is pure
    normalization.  var = E[x^2] - mean^2 (clamped at 0 for safety)."""
    inv_n = 1.0 / float(n)
    s = jnp.sum(x, axis=0, keepdims=True)
    sq = jnp.sum(x * x, axis=0, keepdims=True)
    mean = s * inv_n
    var = jnp.maximum(sq * inv_n - mean * mean, 0.0)
    return (x - mean) * jax.lax.rsqrt(var + LN_EPS)


def baseline_mlp_kernel(x_ref, w1_ref, w2_ref, w3_ref, vec_ref, o_ref):
    """Feature-major fused MLP for one batch tile.

    x_ref  : [K_pad, TB]  bf16  concat([cf, alpha]).T, zero-padded rows
    w1_ref : [2H, K_pad]  bf16  W1^T (alpha row included), zero-padded cols
    w2_ref : [H, 2H]      bf16  (gamma1-folded W2)^T
    w3_ref : [H/2, H]     bf16  (gamma2-folded W3)^T
    vec_ref: [2H, 8]      f32   cols: b1 | b2' | b3' | w4 | b4 | 0..
    o_ref  : [1, TB]      f32
    """
    H2 = w1_ref.shape[0]
    H = w2_ref.shape[0]
    Hq = w3_ref.shape[0]

    b1 = vec_ref[:, 0:1]            # [2H, 1]
    b2 = vec_ref[0:H, 1:2]          # [H, 1]    (beta1 @ W2 + b2, pre-folded)
    b3 = vec_ref[0:Hq, 2:3]         # [H/2, 1]  (beta2 @ W3 + b3, pre-folded)
    w4 = vec_ref[0:Hq, 3:4]         # [H/2, 1]  final weight as a column
    b4 = vec_ref[0:1, 4:5]          # [1, 1]

    x = x_ref[...]                  # [K_pad, TB] bf16

    # ---- Layer 1: fused concat -> Linear -> ReLU -> LN (no affine) ---------
    h = jnp.dot(w1_ref[...], x, preferred_element_type=jnp.float32)   # [2H, TB]
    h = jnp.maximum(h + b1, 0.0)
    h = _ln_cols(h, H2)             # gamma1/beta1 folded into W2/b2
    # Dropout(0.2): identity in eval mode.

    # ---- Layer 2: Linear -> ReLU -> LN (no affine) --------------------------
    h = jnp.dot(w2_ref[...], h.astype(jnp.bfloat16),
                preferred_element_type=jnp.float32)                   # [H, TB]
    h = jnp.maximum(h + b2, 0.0)
    h = _ln_cols(h, H)              # gamma2/beta2 folded into W3/b3
    # Dropout(0.2): identity in eval mode.

    # ---- Layer 3: Linear -> ReLU --------------------------------------------
    h = jnp.dot(w3_ref[...], h.astype(jnp.bfloat16),
                preferred_element_type=jnp.float32)                   # [H/2, TB]
    h = jnp.maximum(h + b3, 0.0)
    # Dropout(0.1): identity in eval mode.

    # ---- Layer 4: N=1 output -> VPU mul + sublane reduce (skip MXU pass) ----
    out = jnp.sum(h * w4, axis=0, keepdims=True) + b4                 # [1, TB]
    o_ref[...] = out.astype(o_ref.dtype)


def baseline_forward(city_features, alpha, prepared, *, block_batch=1024):
    """city_features: [B, F] f32, alpha: [B, 1] f32 -> [B, 1] f32."""
    w1t, w2t, w3t, vec = (prepared["w1t"], prepared["w2t"],
                          prepared["w3t"], prepared["vec"])
    B, F = city_features.shape
    H2, K_pad = w1t.shape
    H = w2t.shape[0]
    Hq = w3t.shape[0]
    K = F + 1

    # Batch tile: multiple of 128 (lane-dense), large to amortize per-step
    # pipeline overhead, but capped at half the padded batch so the parallel
    # grid has >=2 steps (v7x: 2 TensorCores) when B is big enough.
    B128 = _round_up(max(B, 1), 128)
    tb_cap = B128 if B128 < 256 else _round_up(B128 // 2, 128)
    TB = max(128, min(block_batch, tb_cap))
    Bp = _round_up(B, TB)
    grid = (Bp // TB,)

    # Feature-major bf16 input slab: rows 0..F-1 = cf^T, row F = alpha^T.
    # One XLA transpose/pad outside the kernel; all kernel vregs lane-dense.
    x = jnp.concatenate([city_features, alpha], axis=-1)        # [B, K]
    x_t = jnp.transpose(x).astype(jnp.bfloat16)                 # [K, B]
    x_t = jnp.pad(x_t, ((0, K_pad - K), (0, Bp - B)))           # [K_pad, Bp]

    flops = 2 * Bp * (K_pad * H2 + H2 * H + H * Hq + Hq)
    bytes_accessed = (x_t.size * 2 + Bp * 4 +
                      w1t.size * 2 + w2t.size * 2 + w3t.size * 2 + vec.size * 4)

    out = pl.pallas_call(
        baseline_mlp_kernel,
        out_shape=jax.ShapeDtypeStruct((1, Bp), jnp.float32),
        grid=grid,
        in_specs=[
            pl.BlockSpec((K_pad, TB), lambda i: (0, i)),   # input (batch-tiled)
            pl.BlockSpec((H2, K_pad), lambda i: (0, 0)),   # W1^T (resident)
            pl.BlockSpec((H, H2), lambda i: (0, 0)),       # W2'^T (resident)
            pl.BlockSpec((Hq, H), lambda i: (0, 0)),       # W3'^T (resident)
            pl.BlockSpec((H2, 8), lambda i: (0, 0)),       # packed small vectors
        ],
        out_specs=pl.BlockSpec((1, TB), lambda i: (0, i)),  # lane-dense output
        compiler_params=pltpu.CompilerParams(
            dimension_semantics=("parallel",),
            vmem_limit_bytes=16 * 1024 * 1024,
        ),
        cost_estimate=pl.CostEstimate(
            flops=flops, transcendentals=2 * Bp, bytes_accessed=bytes_accessed),
    )(x_t, w1t, w2t, w3t, vec)

    return out.reshape(Bp, 1)[:B]


# --------------------------------------------------------------------------- #
# Parameter construction / folding
# --------------------------------------------------------------------------- #
def init_raw_params(key, node_features, edge_features, hidden_dim):
    """PyTorch-style raw params (nn.Linear default init; LN affine perturbed
    slightly from gamma=1/beta=0 so the folding path is actually exercised)."""
    in_dim = node_features + edge_features + 1
    dims = [(in_dim, hidden_dim * 2),
            (hidden_dim * 2, hidden_dim),
            (hidden_dim, hidden_dim // 2),
            (hidden_dim // 2, 1)]
    params = {}
    keys = jax.random.split(key, 2 * len(dims) + 4)
    for i, (fi, fo) in enumerate(dims):
        bound = 1.0 / (fi ** 0.5)
        params[f"w{i+1}"] = jax.random.uniform(
            keys[2 * i], (fi, fo), jnp.float32, -bound, bound)
        params[f"b{i+1}"] = jax.random.uniform(
            keys[2 * i + 1], (1, fo), jnp.float32, -bound, bound)
    params["g1"] = 1.0 + 0.1 * jax.random.normal(keys[-4], (1, hidden_dim * 2), jnp.float32)
    params["be1"] = 0.1 * jax.random.normal(keys[-3], (1, hidden_dim * 2), jnp.float32)
    params["g2"] = 1.0 + 0.1 * jax.random.normal(keys[-2], (1, hidden_dim), jnp.float32)
    params["be2"] = 0.1 * jax.random.normal(keys[-1], (1, hidden_dim), jnp.float32)
    return params


def prepare_params(raw, node_features, edge_features):
    """Feature-major (transposed) bf16 weights with the LN affine folded into
    the next Linear, W1's alpha row kept in place (K padded up), and all small
    vectors packed column-major into one [2H, 8] f32 buffer."""
    F = node_features + edge_features
    K = F + 1
    K_pad = _round_up(K, 16)                         # bf16-sublane friendly

    w1 = raw["w1"]                                   # [K, 2H]
    H2 = w1.shape[1]
    H = raw["w2"].shape[1]
    Hq = raw["w3"].shape[1]

    w1t = jnp.pad(jnp.transpose(w1), ((0, 0), (0, K_pad - K)))      # [2H, K_pad]
    w1t = w1t.astype(jnp.bfloat16)

    # LN1 affine folded into Linear2, LN2 affine into Linear3 (transposed).
    w2t = (jnp.transpose(raw["w2"]) * raw["g1"]).astype(jnp.bfloat16)   # [H, 2H]
    b2f = raw["be1"] @ raw["w2"] + raw["b2"]                            # [1, H]
    w3t = (jnp.transpose(raw["w3"]) * raw["g2"]).astype(jnp.bfloat16)   # [Hq, H]
    b3f = raw["be2"] @ raw["w3"] + raw["b3"]                            # [1, Hq]

    vec = jnp.zeros((H2, 8), jnp.float32)
    vec = vec.at[:, 0].set(raw["b1"].reshape(-1))        # b1
    vec = vec.at[:H, 1].set(b2f.reshape(-1))             # folded b2
    vec = vec.at[:Hq, 2].set(b3f.reshape(-1))            # folded b3
    vec = vec.at[:Hq, 3].set(raw["w4"].reshape(-1))      # W4 as a column
    vec = vec.at[0, 4].set(raw["b4"].reshape(-1)[0])     # b4

    return {"w1t": w1t, "w2t": w2t, "w3t": w3t, "vec": vec}


# --------------------------------------------------------------------------- #
# References
# --------------------------------------------------------------------------- #
def mirror_reference(city_features, alpha, prepared):
    """Pure-JAX reference with the kernel's exact numerics (transposed layout,
    bf16 dots, folded LN affine, one-pass variance)."""
    w1t, w2t, w3t, vec = (prepared["w1t"], prepared["w2t"],
                          prepared["w3t"], prepared["vec"])
    H2, K_pad = w1t.shape
    H = w2t.shape[0]
    Hq = w3t.shape[0]
    B, F = city_features.shape
    K = F + 1

    b1, b2, b3 = vec[:, 0:1], vec[:H, 1:2], vec[:Hq, 2:3]
    w4, b4 = vec[:Hq, 3:4], vec[0:1, 4:5]

    x = jnp.concatenate([city_features, alpha], axis=-1)
    x = jnp.pad(jnp.transpose(x).astype(jnp.bfloat16), ((0, K_pad - K), (0, 0)))

    h = jnp.dot(w1t, x, preferred_element_type=jnp.float32)
    h = _ln_cols(jnp.maximum(h + b1, 0.0), H2)
    h = jnp.dot(w2t, h.astype(jnp.bfloat16), preferred_element_type=jnp.float32)
    h = _ln_cols(jnp.maximum(h + b2, 0.0), H)
    h = jnp.dot(w3t, h.astype(jnp.bfloat16), preferred_element_type=jnp.float32)
    h = jnp.maximum(h + b3, 0.0)
    out = jnp.sum(h * w4, axis=0, keepdims=True) + b4
    return jnp.transpose(out)                              # [B, 1]


def full_precision_reference(city_features, alpha, raw):
    """Unfolded f32 reference matching the PyTorch module (eval mode)."""
    def ln(x, g, b):
        mean = jnp.mean(x, axis=-1, keepdims=True)
        var = jnp.mean((x - mean) ** 2, axis=-1, keepdims=True)
        return (x - mean) * jax.lax.rsqrt(var + LN_EPS) * g + b

    x = jnp.concatenate([city_features, alpha], axis=-1)
    h = jnp.maximum(x @ raw["w1"] + raw["b1"], 0.0)
    h = ln(h, raw["g1"], raw["be1"])
    h = jnp.maximum(h @ raw["w2"] + raw["b2"], 0.0)
    h = ln(h, raw["g2"], raw["be2"])
    h = jnp.maximum(h @ raw["w3"] + raw["b3"], 0.0)
    return h @ raw["w4"] + raw["b4"]


if __name__ == "__main__":
    node_features = 10
    edge_features = 5
    hidden_dim = 32
    batch = 8

    key = jax.random.PRNGKey(0)
    k_param, k_city, k_alpha = jax.random.split(key, 3)

    raw = init_raw_params(k_param, node_features, edge_features, hidden_dim)
    prepared = prepare_params(raw, node_features, edge_features)

    city_features = jax.random.normal(
        k_city, (batch, node_features + edge_features), jnp.float32)
    alpha = jax.random.uniform(k_alpha, (batch, 1), jnp.float32)

    out = baseline_forward(city_features, alpha, prepared)
    out = jax.block_until_ready(out)
    assert out.shape == (batch, 1)
    assert bool(jnp.all(jnp.isfinite(out)))

    # Exact-numerics check (same transposed bf16/fold/one-pass-LN choices).
    mirror = mirror_reference(city_features, alpha, prepared)
    assert jnp.allclose(out, mirror, atol=2e-3, rtol=2e-3), (
        f"mirror mismatch: {jnp.max(jnp.abs(out - mirror))}")

    # Semantic check vs the full-precision (f32, unfolded) PyTorch-equivalent.
    exact = full_precision_reference(city_features, alpha, raw)
    assert jnp.allclose(out, exact, atol=5e-2, rtol=5e-2), (
        f"semantic mismatch: {jnp.max(jnp.abs(out - exact))}")

    print("KERNEL_OK")
</pallas_src>

<mosaic_0001>
module attributes {stable_mosaic.version = 11 : i64} {
  func.func @baseline_mlp_kernel(%arg0: i32, %arg1: memref<16x128xbf16, #tpu.memory_space<vmem>>, %arg2: memref<64x16xbf16, #tpu.memory_space<vmem>>, %arg3: memref<32x64xbf16, #tpu.memory_space<vmem>>, %arg4: memref<16x32xbf16, #tpu.memory_space<vmem>>, %arg5: memref<64x8xf32, #tpu.memory_space<vmem>>, %arg6: memref<1x128xf32, #tpu.memory_space<vmem>>) attributes {dimension_semantics = [#tpu.dimension_semantics<parallel>], iteration_bounds = array<i64: 1>, scalar_prefetch = 0 : i64, scratch_operands = 0 : i64, tpu.core_type = #tpu.core_type<tc>, window_params = [{transform_indices = @transform_0, window_bounds = array<i64: 16, 128>}, {pipeline_mode = #tpu.pipeline_mode<synchronous>, transform_indices = @transform_1, window_bounds = array<i64: 64, 16>}, {pipeline_mode = #tpu.pipeline_mode<synchronous>, transform_indices = @transform_2, window_bounds = array<i64: 32, 64>}, {pipeline_mode = #tpu.pipeline_mode<synchronous>, transform_indices = @transform_3, window_bounds = array<i64: 16, 32>}, {pipeline_mode = #tpu.pipeline_mode<synchronous>, transform_indices = @transform_4, window_bounds = array<i64: 64, 8>}, {transform_indices = @transform_5, window_bounds = array<i64: 1, 128>}]} {
    %c0 = arith.constant 0 : index
    %c0_0 = arith.constant 0 : index
    %0 = vector.load %arg5[%c0, %c0_0] : memref<64x8xf32, #tpu.memory_space<vmem>>, vector<64x1xf32>
    %c0_1 = arith.constant 0 : index
    %c1 = arith.constant 1 : index
    %1 = vector.load %arg5[%c0_1, %c1] : memref<64x8xf32, #tpu.memory_space<vmem>>, vector<32x1xf32>
    %c0_2 = arith.constant 0 : index
    %c2 = arith.constant 2 : index
    %2 = vector.load %arg5[%c0_2, %c2] : memref<64x8xf32, #tpu.memory_space<vmem>>, vector<16x1xf32>
    %c0_3 = arith.constant 0 : index
    %c3 = arith.constant 3 : index
    %3 = vector.load %arg5[%c0_3, %c3] : memref<64x8xf32, #tpu.memory_space<vmem>>, vector<16x1xf32>
    %c0_4 = arith.constant 0 : index
    %c4 = arith.constant 4 : index
    %4 = vector.load %arg5[%c0_4, %c4] : memref<64x8xf32, #tpu.memory_space<vmem>>, vector<1x1xf32>
    %c0_5 = arith.constant 0 : index
    %c0_6 = arith.constant 0 : index
    %5 = vector.load %arg1[%c0_5, %c0_6] : memref<16x128xbf16, #tpu.memory_space<vmem>>, vector<16x128xbf16>
    %c0_7 = arith.constant 0 : index
    %c0_8 = arith.constant 0 : index
    %6 = vector.load %arg2[%c0_7, %c0_8] : memref<64x16xbf16, #tpu.memory_space<vmem>>, vector<64x16xbf16>
    %cst = arith.constant dense<0.000000e+00> : vector<64x128xf32>
    %7 = tpu.matmul %6, %5, %cst {dimension_numbers = #tpu.dot_dimension_numbers<[1], [0], [0], [1], [0, 0, 1, 1], [], []>} : vector<64x16xbf16>, vector<16x128xbf16>, vector<64x128xf32> -> vector<64x128xf32>
    %8 = vector.broadcast %0 : vector<64x1xf32> to vector<64x128xf32>
    %9 = arith.addf %7, %8 : vector<64x128xf32>
    %cst_9 = arith.constant 0.000000e+00 : f32
    %10 = vector.broadcast %cst_9 : f32 to vector<64x128xf32>
    %11 = arith.maximumf %9, %10 : vector<64x128xf32>
    %cst_10 = arith.constant dense<0.000000e+00> : vector<128xf32>
    %12 = vector.multi_reduction <add>, %11, %cst_10 [0] : vector<64x128xf32> to vector<128xf32>
    %13 = vector.shape_cast %12 : vector<128xf32> to vector<1x128xf32>
    %14 = arith.mulf %11, %11 : vector<64x128xf32>
    %cst_11 = arith.constant dense<0.000000e+00> : vector<128xf32>
    %15 = vector.multi_reduction <add>, %14, %cst_11 [0] : vector<64x128xf32> to vector<128xf32>
    %16 = vector.shape_cast %15 : vector<128xf32> to vector<1x128xf32>
    %cst_12 = arith.constant 1.562500e-02 : f32
    %17 = vector.broadcast %cst_12 : f32 to vector<1x128xf32>
    %18 = arith.mulf %13, %17 : vector<1x128xf32>
    %cst_13 = arith.constant 1.562500e-02 : f32
    %19 = vector.broadcast %cst_13 : f32 to vector<1x128xf32>
    %20 = arith.mulf %16, %19 : vector<1x128xf32>
    %21 = arith.mulf %18, %18 : vector<1x128xf32>
    %22 = arith.subf %20, %21 : vector<1x128xf32>
    %cst_14 = arith.constant 0.000000e+00 : f32
    %23 = vector.broadcast %cst_14 : f32 to vector<1x128xf32>
    %24 = arith.maximumf %22, %23 : vector<1x128xf32>
    %25 = vector.broadcast %18 : vector<1x128xf32> to vector<64x128xf32>
    %26 = arith.subf %11, %25 : vector<64x128xf32>
    %cst_15 = arith.constant 9.99999974E-6 : f32
    %27 = vector.broadcast %cst_15 : f32 to vector<1x128xf32>
    %28 = arith.addf %24, %27 : vector<1x128xf32>
    %29 = math.rsqrt %28 : vector<1x128xf32>
    %30 = vector.broadcast %29 : vector<1x128xf32> to vector<64x128xf32>
    %31 = arith.mulf %26, %30 : vector<64x128xf32>
    %c0_16 = arith.constant 0 : index
    %c0_17 = arith.constant 0 : index
    %32 = vector.load %arg3[%c0_16, %c0_17] : memref<32x64xbf16, #tpu.memory_space<vmem>>, vector<32x64xbf16>
    %33 = arith.truncf %31 : vector<64x128xf32> to vector<64x128xbf16>
    %cst_18 = arith.constant dense<0.000000e+00> : vector<32x128xf32>
    %34 = tpu.matmul %32, %33, %cst_18 {dimension_numbers = #tpu.dot_dimension_numbers<[1], [0], [0], [1], [0, 0, 1, 1], [], []>} : vector<32x64xbf16>, vector<64x128xbf16>, vector<32x128xf32> -> vector<32x128xf32>
    %35 = vector.broadcast %1 : vector<32x1xf32> to vector<32x128xf32>
    %36 = arith.addf %34, %35 : vector<32x128xf32>
    %cst_19 = arith.constant 0.000000e+00 : f32
    %37 = vector.broadcast %cst_19 : f32 to vector<32x128xf32>
    %38 = arith.maximumf %36, %37 : vector<32x128xf32>
    %cst_20 = arith.constant dense<0.000000e+00> : vector<128xf32>
    %39 = vector.multi_reduction <add>, %38, %cst_20 [0] : vector<32x128xf32> to vector<128xf32>
    %40 = vector.shape_cast %39 : vector<128xf32> to vector<1x128xf32>
    %41 = arith.mulf %38, %38 : vector<32x128xf32>
    %cst_21 = arith.constant dense<0.000000e+00> : vector<128xf32>
    %42 = vector.multi_reduction <add>, %41, %cst_21 [0] : vector<32x128xf32> to vector<128xf32>
    %43 = vector.shape_cast %42 : vector<128xf32> to vector<1x128xf32>
    %cst_22 = arith.constant 3.125000e-02 : f32
    %44 = vector.broadcast %cst_22 : f32 to vector<1x128xf32>
    %45 = arith.mulf %40, %44 : vector<1x128xf32>
    %cst_23 = arith.constant 3.125000e-02 : f32
    %46 = vector.broadcast %cst_23 : f32 to vector<1x128xf32>
    %47 = arith.mulf %43, %46 : vector<1x128xf32>
    %48 = arith.mulf %45, %45 : vector<1x128xf32>
    %49 = arith.subf %47, %48 : vector<1x128xf32>
    %cst_24 = arith.constant 0.000000e+00 : f32
    %50 = vector.broadcast %cst_24 : f32 to vector<1x128xf32>
    %51 = arith.maximumf %49, %50 : vector<1x128xf32>
    %52 = vector.broadcast %45 : vector<1x128xf32> to vector<32x128xf32>
    %53 = arith.subf %38, %52 : vector<32x128xf32>
    %cst_25 = arith.constant 9.99999974E-6 : f32
    %54 = vector.broadcast %cst_25 : f32 to vector<1x128xf32>
    %55 = arith.addf %51, %54 : vector<1x128xf32>
    %56 = math.rsqrt %55 : vector<1x128xf32>
    %57 = vector.broadcast %56 : vector<1x128xf32> to vector<32x128xf32>
    %58 = arith.mulf %53, %57 : vector<32x128xf32>
    %c0_26 = arith.constant 0 : index
    %c0_27 = arith.constant 0 : index
    %59 = vector.load %arg4[%c0_26, %c0_27] : memref<16x32xbf16, #tpu.memory_space<vmem>>, vector<16x32xbf16>
    %60 = arith.truncf %58 : vector<32x128xf32> to vector<32x128xbf16>
    %cst_28 = arith.constant dense<0.000000e+00> : vector<16x128xf32>
    %61 = tpu.matmul %59, %60, %cst_28 {dimension_numbers = #tpu.dot_dimension_numbers<[1], [0], [0], [1], [0, 0, 1, 1], [], []>} : vector<16x32xbf16>, vector<32x128xbf16>, vector<16x128xf32> -> vector<16x128xf32>
    %62 = vector.broadcast %2 : vector<16x1xf32> to vector<16x128xf32>
    %63 = arith.addf %61, %62 : vector<16x128xf32>
    %cst_29 = arith.constant 0.000000e+00 : f32
    %64 = vector.broadcast %cst_29 : f32 to vector<16x128xf32>
    %65 = arith.maximumf %63, %64 : vector<16x128xf32>
    %66 = vector.broadcast %3 : vector<16x1xf32> to vector<16x128xf32>
    %67 = arith.mulf %65, %66 : vector<16x128xf32>
    %cst_30 = arith.constant dense<0.000000e+00> : vector<128xf32>
    %68 = vector.multi_reduction <add>, %67, %cst_30 [0] : vector<16x128xf32> to vector<128xf32>
    %69 = vector.shape_cast %68 : vector<128xf32> to vector<1x128xf32>
    %70 = vector.broadcast %4 : vector<1x1xf32> to vector<1x128xf32>
    %71 = arith.addf %69, %70 : vector<1x128xf32>
    %c0_31 = arith.constant 0 : index
    %c0_32 = arith.constant 0 : index
    %72 = vector.load %arg6[%c0_31, %c0_32] : memref<1x128xf32, #tpu.memory_space<vmem>>, vector<1x128xf32>
    tpu.vector_store %arg6[%c0_31, %c0_32], %71 {strides = array<i32>} : memref<1x128xf32, #tpu.memory_space<vmem>>, vector<1x128xf32>,
    return
  }
  func.func @transform_0(%arg0: i32) -> (i32, i32) {
    %c0_i32 = arith.constant 0 : i32
    %c0_i32_0 = arith.constant 0 : i32
    return %c0_i32, %arg0 : i32, i32
  }
  func.func @transform_1(%arg0: i32) -> (i32, i32) {
    %c0_i32 = arith.constant 0 : i32
    %c0_i32_0 = arith.constant 0 : i32
    %c0_i32_1 = arith.constant 0 : i32
    return %c0_i32, %c0_i32_0 : i32, i32
  }
  func.func @transform_2(%arg0: i32) -> (i32, i32) {
    %c0_i32 = arith.constant 0 : i32
    %c0_i32_0 = arith.constant 0 : i32
    %c0_i32_1 = arith.constant 0 : i32
    return %c0_i32, %c0_i32_0 : i32, i32
  }
  func.func @transform_3(%arg0: i32) -> (i32, i32) {
    %c0_i32 = arith.constant 0 : i32
    %c0_i32_0 = arith.constant 0 : i32
    %c0_i32_1 = arith.constant 0 : i32
    return %c0_i32, %c0_i32_0 : i32, i32
  }
  func.func @transform_4(%arg0: i32) -> (i32, i32) {
    %c0_i32 = arith.constant 0 : i32
    %c0_i32_0 = arith.constant 0 : i32
    %c0_i32_1 = arith.constant 0 : i32
    return %c0_i32, %c0_i32_0 : i32, i32
  }
  func.func @transform_5(%arg0: i32) -> (i32, i32) {
    %c0_i32 = arith.constant 0 : i32
    %c0_i32_0 = arith.constant 0 : i32
    return %c0_i32, %arg0 : i32, i32
  }
}

</mosaic_0001>

<bundles_post_ra>
// kernel: tpu_custom_call.1
= control target key start
LH: loop header
LB: loop body
LE: loop exit
PB: predicated region body
PF: predicated region fallthrough
CT: control target
= control target key end

     0   :  { %vm107_vm0 = vcmask 130048   ;;  %v594_v3 = vmov 0   ;;  %s740_s0 = inlined_call_operand.vmem [shape: bf16[16,128], index: 0, kind: input, shape index: {}]   ;;  %s741_s1 = inlined_call_operand.vmem [shape: bf16[64,16], index: 1, kind: input, shape index: {}]   ;;  %s742_s2 = inlined_call_operand.vmem [shape: bf16[32,64], index: 2, kind: input, shape index: {}]   ;;  %s743_s3 = inlined_call_operand.vmem [shape: bf16[16,32], index: 3, kind: input, shape index: {}]   ;;  %s744_s4 = inlined_call_operand.vmem [shape: f32[64,8], index: 4, kind: input, shape index: {}]   ;;  %s745_s5 = inlined_call_operand.hbm [shape: f32[1,128], index: 5, kind: output, shape index: {}]  }
   0x1   :  { %v558_v0 = vld [vmem:[%s740_s0] sm:$0xff]   ;;  %v560_v2 = vld [vmem:[%s741_s1 + $0x8] sm:$0xff]   ;;  %550 = vset.pattern.permute.xlu0 %v594_v3  ;;  %v561_v4 = vld [vmem:[%s741_s1 + $0x10] sm:$0xff]   ;;  %551 = vset.pattern.permute.xlu1 %v594_v3 }
   0x2   :  { %v559_v1 = vld [vmem:[%s741_s1] sm:$0xff]   ;;  %512 = vmatprep.subr.bf16.mxu0 %v558_v0  ;;  %v24_v6 = vld [vmem:[%s744_s4 + $0x10] sm:$0xff]  ;;  %v659_v7 = vld [vmem:[%s744_s4 + $0x8] sm:$0xff] }
   0x3   :  { %513 = vmatpush3.bf16.msra.mxu0 %v558_v0  ;;  %514 = vmatprep.mubr.msk.bf16.mxu0 %vm107_vm0, %v559_v1  ;;  %v648_v5 = vld [vmem:[%s744_s4] sm:$0xff]  ;;  %v25_v8 = vld [vmem:[%s744_s4 + $0x18] sm:$0xff] }
   0x4   :  { %43 = vperm.xlu0 %550, %v648_v5   ;;  %53 = vperm.xlu1 %551, %v24_v6  }
   0x6   :  { %515 = vmatmul.mubr.msk.bf16.vlgmr.msra.gmra.mrb[0].mxu0 %vm107_vm0, %v560_v2 }
   0x7   :  { %518 = vmatprep.mubr.msk.bf16.mxu0 %vm107_vm0, %v561_v4 }
   0x8   :  { %10 = vsyncpa [#allocation3], 0  ;;  %v562_v9 = vld [vmem:[%s741_s1 + $0x18] sm:$0xff]   ;;  %48 = vperm.xlu0 %550, %v659_v7   ;;  %58 = vperm.xlu1 %551, %v25_v8   ;;  %v26_v10 = vld [vmem:[%s744_s4 + $0x20] sm:$0xff]  ;;  %vm284_vm1 = vcmask 523264   ;;  %v595_v15 = vmov 1  }
   0x9   :  { %v27_v11 = vld [vmem:[%s744_s4 + $0x28] sm:$0xff]  ;;  %v28_v12 = vld [vmem:[%s744_s4 + $0x30] sm:$0xff]  ;;  %v29_v13 = vld [vmem:[%s744_s4 + $0x38] sm:$0xff]  ;;  %vm597_vm2 = vmmov 0   ;;  %vm398_vm3 = vcmask 261120  }
   0xa   :  { %v563_v14 = vld [vmem:[%s742_s2] sm:$0xff]  }
   0xb   :  { %530 = vmatprep.mubr.msk.bf16.mxu1 %vm284_vm1, %v563_v14 }
   0xc   :  { %63 = vperm.xlu0 %550, %v26_v10   ;;  %68 = vperm.xlu1 %551, %v27_v11  }
   0xe   :  { %519 = vmatmul.mubr.msk.bf16.gmra.mrb[4].mxu0 %vm107_vm0, %v562_v9 }
  0x10   :  { %73 = vperm.xlu0 %550, %v28_v12   ;;  %78 = vperm.xlu1 %551, %v29_v13  }
  0x14   :  { %553 = vset.pattern.permute.xlu1 %v595_v15  ;;  %552 = vset.pattern.permute.xlu0 %v595_v15 }
  0x15   :  { %263 = vperm.xlu1 %553, %v659_v7   ;;  %259 = vperm.xlu0 %552, %v648_v5  }
  0x19   :  { %267 = vperm.xlu1 %553, %v24_v6   ;;  %271 = vperm.xlu0 %552, %v25_v8  }
  0x83   :  { %v44_v16 = vpop.permute.xlu0 %43  ;;  %v54_v17 = vpop.permute.xlu1 %53 }
  0x87   :  { %v49_v18 = vpop.permute.xlu0 %48  ;;  %v59_v19 = vpop.permute.xlu1 %58 }
  0x8b   :  { %v64_v22 = vpop.permute.xlu0 %63  ;;  %v69_v28 = vpop.permute.xlu1 %68 }
  0x8f   :  { %v74_v34 = vpop.permute.xlu0 %73  ;;  %v79_v44 = vpop.permute.xlu1 %78 }
  0xd9   :  { %v516_v20 = vpop.f32.mrb[0].mxu0 }
  0xda   :  { %v154_v21 = vpop.f32.mrb[1].mxu0  ;;  %v163_v23 = vadd.f32 %v516_v20, %v54_v17 }
  0xdb   :  { %v155_v24 = vadd.f32 %v154_v21, %v44_v16  ;;  %v517_v25 = vpop.f32.mrb[2].mxu0 }
  0xdc   :  { %v166_v26 = vadd.f32 %v517_v25, %v59_v19  ;;  %v157_v27 = vpop.f32.mrb[3].mxu0  ;;  %v689_v31 = vmax.f32 %v163_v23, 0.0 }
  0xdd   :  { %v687_v29 = vmax.f32 %v155_v24, 0.0  ;;  %v158_v30 = vadd.f32 %v157_v27, %v49_v18 }
  0xde   :  { %v693_v33 = vmax.f32 %v166_v26, 0.0  ;;  %v208_v41 = vmul.f32 %v689_v31, %v689_v31 }
  0xdf   :  { %v691_v32 = vmax.f32 %v158_v30, 0.0  ;;  %v206_v35 = vmul.f32 %v687_v29, %v687_v29 }
  0xe0   :  { %v209_v47 = vmul.f32 %v693_v33, %v693_v33 }
  0xe1   :  { %v193_v36 = vadd.f32 %v691_v32, %v687_v29  ;;  %v207_v37 = vmul.f32 %v691_v32, %v691_v32  ;;  %v520_v38 = vpop.f32.mrb[4].mxu0 }
  0xe2   :  { %v179_v39 = vadd.f32 %v520_v38, %v74_v34  ;;  %v170_v40 = vpop.f32.mrb[5].mxu0 }
  0xe3   :  { %v194_v42 = vadd.f32 %v193_v36, %v689_v31  ;;  %v214_v43 = vadd.f32 %v207_v37, %v206_v35  ;;  %v171_v45 = vadd.f32 %v170_v40, %v64_v22  ;;  %v521_v46 = vpop.f32.mrb[6].mxu0 }
  0xe4   :  { %v182_v48 = vadd.f32 %v521_v46, %v79_v44  ;;  %v173_v49 = vpop.f32.mrb[7].mxu0  ;;  %v191_v54 = vmax.f32 %v179_v39, 0.0 }
  0xe5   :  { %v215_v50 = vadd.f32 %v214_v43, %v208_v41  ;;  %v189_v51 = vmax.f32 %v171_v45, 0.0  ;;  %v195_v52 = vadd.f32 %v194_v42, %v693_v33  ;;  %v174_v53 = vadd.f32 %v173_v49, %v69_v28 }
  0xe6   :  { %v192_v60 = vmax.f32 %v182_v48, 0.0  ;;  %v212_v63 = vmul.f32 %v191_v54, %v191_v54  ;;  %v596_v48 = vmov 0.0   ;;  %v598_v49 = vmov 2  }
  0xe7   :  { %v196_v55 = vadd.f32 %v195_v52, %v189_v51  ;;  %v210_v56 = vmul.f32 %v189_v51, %v189_v51  ;;  %v216_v57 = vadd.f32 %v215_v50, %v209_v47  ;;  %v190_v58 = vmax.f32 %v174_v53, 0.0  ;;  %v564_v47 = vld [vmem:[%s742_s2 + $0x8] sm:$0xff]   ;;  %534 = vmatprep.subr.bf16.mxu0 %v596_v48  ;;  %538 = vmatprep.mubr.msk.bf16.mxu0 %vm597_vm2, %v596_v48  ;;  %v30_v50 = vld [vmem:[%s744_s4] sm:$0x1]  ;;  %v264_v53 = vpop.permute.xlu1 %263 }
  0xe8   :  { %v213_v2 = vmul.f32 %v192_v60, %v192_v60  ;;  %554 = vset.pattern.permute.xlu1 %v598_v49  ;;  %555 = vset.pattern.permute.xlu0 %v598_v49  ;;  %v600_v52 = vmov 4  }
  0xe9   :  { %v217_v59 = vadd.f32 %v216_v57, %v210_v56  ;;  %v197_v61 = vadd.f32 %v196_v55, %v190_v58  ;;  %v211_v62 = vmul.f32 %v190_v58, %v190_v58  ;;  %386 = vperm.xlu1 %554, %v648_v5   ;;  %390 = vperm.xlu0 %555, %v659_v7  }
  0xeb   :  { %v198_v0 = vadd.f32 %v197_v61, %v191_v54  ;;  %v218_v1 = vadd.f32 %v217_v59, %v211_v62  ;;  %v268_v55 = vpop.permute.xlu1 %267 }
  0xed   :  { %v199_v3 = vadd.f32 %v198_v0, %v192_v60  ;;  %v219_v4 = vadd.f32 %v218_v1, %v212_v63  ;;  %557 = vset.pattern.permute.xlu0 %v600_v52 }
  0xee   :  { %464 = vperm.xlu0 %557, %v30_v50  }
  0xef   :  { %v200_v6 = vrot.slane %v199_v3, 4  ;;  %v220_v8 = vadd.f32 %v219_v4, %v213_v2 }
  0xf1   :  { %v201_v9 = vadd.f32 %v200_v6, %v199_v3  ;;  %v221_v10 = vrot.slane %v220_v8, 4 }
  0xf3   :  { %v202_v11 = vrot.slane %v201_v9, 2  ;;  %v222_v12 = vadd.f32 %v221_v10, %v220_v8 }
  0xf5   :  { %v203_v13 = vadd.f32 %v202_v11, %v201_v9  ;;  %v223_v14 = vrot.slane %v222_v12, 2 }
  0xf7   :  { %v204_v15 = vrot.slane %v203_v13, 1  ;;  %v224_v16 = vadd.f32 %v223_v14, %v222_v12 }
  0xf9   :  { %v205_v17 = vadd.f32 %v204_v15, %v203_v13  ;;  %v225_v18 = vrot.slane %v224_v16, 1 }
  0xfb   :  { %v226_v19 = vadd.f32 %v225_v18, %v224_v16  ;;  %v227_v20 = vmul.f32 0.015625, %v205_v17 }
  0xfd   :  { %v228_v21 = vmul.f32 0.015625, %v226_v19  ;;  %v229_v22 = vmul.f32 %v227_v20, %v227_v20  ;;  %v237_v23 = vsub.f32 %v190_v58, %v227_v20  ;;  %v232_v24 = vsub.f32 %v687_v29, %v227_v20 }
  0xfe   :  { %v233_v25 = vsub.f32 %v691_v32, %v227_v20  ;;  %v234_v26 = vsub.f32 %v689_v31, %v227_v20  ;;  %v235_v27 = vsub.f32 %v693_v33, %v227_v20  ;;  %v236_v28 = vsub.f32 %v189_v51, %v227_v20 }
  0xff   :  { %v230_v30 = vsub.f32 %v228_v21, %v229_v22  ;;  %v238_v34 = vsub.f32 %v191_v54, %v227_v20  ;;  %v239_v35 = vsub.f32 %v192_v60, %v227_v20  ;;  %v599_v51 = vmov 3   ;;  %v260_v54 = vpop.permute.xlu0 %259 }
 0x100   :  { %556 = vset.pattern.permute.xlu1 %v599_v51 }
 0x101   :  { %v231_v36 = vmax.f32 %v230_v30, 0.0  ;;  %446 = vperm.xlu1 %556, %v648_v5  }
 0x103   :  { %v240_v37 = vadd.f32 1e-05, %v231_v36  ;;  %v272_v58 = vpop.permute.xlu0 %271 }
 0x105   :  { %566 = vrsqrt.f32 %v240_v37  ;;  %450 = vperm.xlu1 %556, %v659_v7  }
 0x10f   :  { %v567_v38 = vpop.eup %566 }
 0x110   :  { %v242_v39 = vmul.f32 %v567_v38, %v232_v24  ;;  %v243_v40 = vmul.f32 %v567_v38, %v233_v25  ;;  %v244_v41 = vmul.f32 %v567_v38, %v234_v26  ;;  %v245_v42 = vmul.f32 %v567_v38, %v235_v27 }
 0x111   :  { %v246_v43 = vmul.f32 %v567_v38, %v236_v28  ;;  %v247_v29 = vmul.f32 %v567_v38, %v237_v23  ;;  %v248_v44 = vmul.f32 %v567_v38, %v238_v34  ;;  %v249_v32 = vmul.f32 %v567_v38, %v239_v35 }
 0x112   :  { %v254_v45 = vpack.c.bf16 %v243_v40, %v242_v39  ;;  %v255_v31 = vpack.c.bf16 %v245_v42, %v244_v41 }
 0x113   :  { %v256_v46 = vpack.c.bf16 %v247_v29, %v246_v43  ;;  %v257_v33 = vpack.c.bf16 %v249_v32, %v248_v44 }
 0x114   :  { %522 = vmatprep.subr.bf16.mxu1 %v254_v45 }
 0x115   :  { %523 = vmatpush3.bf16.msra.mxu1 %v254_v45 }
 0x116   :  { %524 = vmatprep.subr.bf16.mxu1 %v255_v31 }
 0x119   :  { %525 = vmatpush3.bf16.msra.mxu1 %v255_v31  ;;  %v565_v31 = vld [vmem:[%s743_s3] sm:$0xff]   ;;  %s601_s3 = smov [#allocation2]  }
 0x11a   :  { %526 = vmatprep.subr.bf16.mxu1 %v256_v46  ;;  %s475_s23 = sshll.u32 %s601_s3, 4  ;;  %s476_s23 = int_to_ptr.vmem [resolvable:$true] %s475_s23 }
 0x11b   :  { %s570_s24 = scalar_lea.vmem %s476_s23, 16  ;;  %s574_s25 = scalar_lea.vmem %s476_s23, 32 }
 0x11c   :  { %p571_p0 = scmp.ne.s32.totalorder %s476_s23, %s570_s24  ;;  %p575_p1 = scmp.lt.s32.totalorder %s476_s23, %s476_s23 }
 0x11d   :  { %527 = vmatpush3.bf16.msra.mxu1 %v256_v46  ;;  %p576_p2 = scmp.lt.s32.totalorder %s574_s25, %s570_s24 }
 0x11e   :  { %528 = vmatprep.subr.bf16.mxu1 %v257_v33 }
 0x11f   :  { %p577_p3 = por %p576_p2, %p575_p1 }
 0x121   :  { %529 = vmatpush3.bf16.msra.mxu1 %v257_v33  ;;  %p578_p4 = pnand %p577_p3, %p571_p0 }
 0x124   :  { %531 = vmatmul.mubr.msk.bf16.vlgmr.msra.gmra.mrb[0].mxu1 %vm284_vm1, %v564_v47 }
 0x168   :  { %v387_v46 = vpop.permute.xlu1 %386  ;;  %v391_v49 = vpop.permute.xlu0 %390 }
 0x180   :  { %v447_v33 = vpop.permute.xlu1 %446 }
 0x1f7   :  { %v532_v56 = vpop.f32.mrb[0].mxu1 }
 0x1f8   :  { %v325_v57 = vpop.f32.mrb[1].mxu1  ;;  %v334_v59 = vadd.f32 %v532_v56, %v268_v55 }
 0x1f9   :  { %v326_v60 = vadd.f32 %v325_v57, %v260_v54  ;;  %v533_v61 = vpop.f32.mrb[2].mxu1  ;;  %v451_v57 = vpop.permute.xlu1 %450 }
 0x1fa   :  { %v328_v62 = vpop.f32.mrb[3].mxu1  ;;  %v337_v0 = vadd.f32 %v533_v61, %v272_v58  ;;  %v342_v2 = vmax.f32 %v334_v59, 0.0 }
 0x1fb   :  { %v340_v63 = vmax.f32 %v326_v60, 0.0  ;;  %v329_v1 = vadd.f32 %v328_v62, %v264_v53 }
 0x1fc   :  { %v343_v5 = vmax.f32 %v337_v0, 0.0  ;;  %v355_v7 = vmul.f32 %v342_v2, %v342_v2 }
 0x1fd   :  { %v341_v3 = vmax.f32 %v329_v1, 0.0  ;;  %v353_v4 = vmul.f32 %v340_v63, %v340_v63  ;;  %v465_v1 = vpop.permute.xlu0 %464 }
 0x1fe   :  { %v356_v11 = vmul.f32 %v343_v5, %v343_v5 }
 0x1ff   :  { %v344_v6 = vadd.f32 %v341_v3, %v340_v63  ;;  %v354_v8 = vmul.f32 %v341_v3, %v341_v3 }
 0x201   :  { %v345_v9 = vadd.f32 %v344_v6, %v342_v2  ;;  %v357_v10 = vadd.f32 %v354_v8, %v353_v4 }
 0x203   :  { %v346_v12 = vadd.f32 %v345_v9, %v343_v5  ;;  %v358_v13 = vadd.f32 %v357_v10, %v355_v7 }
 0x205   :  { %v347_v14 = vrot.slane %v346_v12, 4  ;;  %v359_v15 = vadd.f32 %v358_v13, %v356_v11 }
 0x207   :  { %v348_v16 = vadd.f32 %v347_v14, %v346_v12  ;;  %v360_v17 = vrot.slane %v359_v15, 4 }
 0x209   :  { %v349_v18 = vrot.slane %v348_v16, 2  ;;  %v361_v19 = vadd.f32 %v360_v17, %v359_v15 }
 0x20b   :  { %v350_v20 = vadd.f32 %v349_v18, %v348_v16  ;;  %v362_v21 = vrot.slane %v361_v19, 2 }
 0x20d   :  { %v351_v22 = vrot.slane %v350_v20, 1  ;;  %v363_v23 = vadd.f32 %v362_v21, %v361_v19 }
 0x20f   :  { %v352_v24 = vadd.f32 %v351_v22, %v350_v20  ;;  %v364_v25 = vrot.slane %v363_v23, 1 }
 0x211   :  { %v365_v26 = vadd.f32 %v364_v25, %v363_v23  ;;  %v366_v27 = vmul.f32 0.03125, %v352_v24 }
 0x213   :  { %v367_v28 = vmul.f32 0.03125, %v365_v26  ;;  %v368_v30 = vmul.f32 %v366_v27, %v366_v27  ;;  %v372_v34 = vsub.f32 %v341_v3, %v366_v27  ;;  %v371_v35 = vsub.f32 %v340_v63, %v366_v27 }
 0x214   :  { %v373_v36 = vsub.f32 %v342_v2, %v366_v27  ;;  %v374_v37 = vsub.f32 %v343_v5, %v366_v27 }
 0x215   :  { %v369_v38 = vsub.f32 %v367_v28, %v368_v30 }
 0x217   :  { %v370_v39 = vmax.f32 %v369_v38, 0.0 }
 0x219   :  { %v375_v40 = vadd.f32 1e-05, %v370_v39 }
 0x21b   :  { %568 = vrsqrt.f32 %v375_v40 }
 0x225   :  { %v569_v41 = vpop.eup %568 }
 0x226   :  { %v378_v42 = vmul.f32 %v569_v41, %v372_v34  ;;  %v377_v43 = vmul.f32 %v569_v41, %v371_v35  ;;  %v379_v29 = vmul.f32 %v569_v41, %v373_v36  ;;  %v380_v44 = vmul.f32 %v569_v41, %v374_v37 }
 0x228   :  { %v383_v32 = vpack.c.bf16 %v378_v42, %v377_v43  ;;  %v384_v45 = vpack.c.bf16 %v380_v44, %v379_v29 }
 0x22a   :  { %535 = vmatpush3.bf16.msra.mxu0 %v383_v32 }
 0x22b   :  { %536 = vmatprep.subr.bf16.mxu0 %v596_v48 }
 0x22e   :  { %537 = vmatpush3.bf16.msra.mxu0 %v384_v45 }
 0x231   :  { %539 = vmatmul.mubr.msk.bf16.vlgmr.msra.gmra.mrb[8].mxu0 %vm398_vm3, %v565_v31 }
 0x304   :  { %v436_v47 = vpop.f32.mrb[8].mxu0 }
 0x305   :  { %v437_v50 = vadd.f32 %v436_v47, %v387_v46  ;;  %v540_v51 = vpop.f32.mrb[9].mxu0 }
 0x306   :  { %v439_v52 = vpop.f32.mrb[10].mxu0 }
 0x307   :  { %v443_v53 = vmax.f32 %v437_v50, 0.0  ;;  %v440_v54 = vadd.f32 %v439_v52, %v391_v49  ;;  %v541_v55 = vpop.f32.mrb[11].mxu0 }
 0x309   :  { %v444_v56 = vmax.f32 %v440_v54, 0.0  ;;  %v453_v48 = vmul.f32 %v447_v33, %v443_v53 }
 0x30b   :  { %v454_v58 = vmul.f32 %v451_v57, %v444_v56 }
 0x30d   :  { %v455_v59 = vadd.f32 %v454_v58, %v453_v48 }
 0x30f   :  { %v456_v60 = vrot.slane %v455_v59, 4 }
 0x311   :  { %v457_v61 = vadd.f32 %v456_v60, %v455_v59 }
 0x313   :  { %v458_v62 = vrot.slane %v457_v61, 2 }
 0x315   :  { %v459_v63 = vadd.f32 %v458_v62, %v457_v61 }
 0x317   :  { %v460_v0 = vrot.slane %v459_v63, 1 }
 0x319   :  { %v461_v2 = vadd.f32 %v460_v0, %v459_v63 }
 0x31b   :  { %v467_v3 = vadd.f32 %v465_v1, %v461_v2 }
 0x31d   :  { %468 = vst [vmem:[#allocation2] sm:$0x1] %v467_v3 }
 0x31e   :  { %581 = shalt.err (!%p578_p4)
}
 0x31f   :  { %s582_s27 = scalar_lea.hbm %s745_s5, 16 }
 0x320   :  { %p583_p5 = scmp.ne.s32.totalorder %s745_s5, %s582_s27  ;;  %p586_p6 = scmp.lt.u32.totalorder %s582_s27, %s745_s5 }
 0x322   :  { %p588_p7 = pnand %p586_p6, %p583_p5 }
 0x324   :  { %591 = shalt.err (!%p588_p7)
}
 0x325   :  { %478 = dma.vmem_to_hbm [thread:$0]  %s476_s23, 16, %s745_s5, [#allocation3]  }
 0x326   :  { %592 = dma.done.wait [#allocation3], 16  }
 0x327   :  { %593 = vsyncadd [#allocation3], 4294967280 }
 0x328   :  { %482 = vsyncpa [#allocation3], 1 }

</bundles_post_ra>
